<compile_context>
chip_gen: v6e
topology: v6e:2x2x1
jax: 0.10.0
libtpu: 0.0.40
codegen_flags: <defaults>
</compile_context>

<pallas_src>
import jax
import jax.numpy as jnp
from jax import lax
from jax.experimental import pallas as pl
from jax.experimental.pallas import tpu as pltpu


# ---------------- parameter / index helpers (plain-JAX glue) ----------------

def generate_perfect_shuffle(k, n):
    return [(i % k) * (n // k) + i // k for i in range(n)]


def block_diag_3d(blocks):
    """(k, b1, b2) -> (k*b1, k*b2) block-diagonal matrix."""
    k, b1, b2 = blocks.shape
    eye = jnp.eye(k, dtype=blocks.dtype)
    return jnp.einsum('ij,irc->irjc', eye, blocks).reshape(k * b1, k * b2)


def _round_tile(tile_n, n):
    """Clamp tile_n to a multiple of 8 (sublane) and to the problem size."""
    tile_n = max(8, (int(tile_n) // 8) * 8)
    n_ceil8 = ((max(int(n), 1) + 7) // 8) * 8
    return min(tile_n, n_ceil8)


# ---------------- shared in-kernel row gather (8-row groups) ----------------

def _gather_rows_by_groups(ids_ref, base, src_ref, dst_ref, n_rows):
    """dst_ref[t, :] = src_ref[ids_ref[base + t], :]  for t in [0, n_rows).

    Rows are processed 8 at a time: 8 scalar id reads from SMEM, then either
    one contiguous (8, M) copy (consecutive ids — the common unmasked-token
    case) or a vreg-assembled concat of 8 single rows; in both cases a single
    full (unmasked) store per group.
    """
    n_groups = n_rows // 8

    @pl.loop(0, n_groups)
    def _(g):
        off = pl.multiple_of(g * 8, 8)
        rows = [ids_ref[base + off + t] for t in range(8)]
        r0 = rows[0]
        consec = rows[1] == r0 + 1
        for t in range(2, 8):
            consec = jnp.logical_and(consec, rows[t] == r0 + t)

        @pl.when(consec)
        def _():
            dst_ref[pl.ds(off, 8), :] = (
                src_ref[pl.ds(r0, 8), :].astype(dst_ref.dtype))

        @pl.when(jnp.logical_not(consec))
        def _():
            chunk = jnp.concatenate(
                [src_ref[pl.ds(r, 1), :] for r in rows], axis=0)
            dst_ref[pl.ds(off, 8), :] = chunk.astype(dst_ref.dtype)


# ---------------- Pallas kernels ----------------

def _factor_matmul_kernel(ids_ref, blp_ref, br_ref, o_ref, gath_ref):
    """Per tile: gather TN rows of the small f32 left factor, cast to bf16,
    one MXU matmul (TN, M) @ (M, E_pad) with f32 accumulation."""
    tn = o_ref.shape[0]
    base = pl.program_id(0) * tn
    _gather_rows_by_groups(ids_ref, base, blp_ref, gath_ref, tn)
    o_ref[...] = jnp.dot(
        gath_ref[...].astype(jnp.bfloat16), br_ref[...],
        preferred_element_type=jnp.float32).astype(o_ref.dtype)


def _table_gather_kernel(ids_ref, tab_ref, o_ref):
    """Per tile: pure row gather from the dense (V, E_pad) table."""
    tn = o_ref.shape[0]
    base = pl.program_id(0) * tn
    _gather_rows_by_groups(ids_ref, base, tab_ref, o_ref, tn)


# ---------------- pallas_call wrappers ----------------

def monarch_factor_matmul(ids_flat, blp_f32, br_bf16_p, e, *, tile_n=256,
                          out_dtype=jnp.float32):
    """ids_flat: (N,) int32; blp_f32: (V, M) f32; br_bf16_p: (M, E_pad) bf16."""
    n = int(ids_flat.shape[0])
    v, m = blp_f32.shape
    m2, e_pad = br_bf16_p.shape
    assert m == m2 and e_pad % 128 == 0 and e <= e_pad

    tile_n = _round_tile(tile_n, n)
    n_pad = ((n + tile_n - 1) // tile_n) * tile_n
    num_tiles = n_pad // tile_n
    ids_p = jnp.pad(ids_flat.astype(jnp.int32), (0, n_pad - n))

    out_itemsize = jnp.dtype(out_dtype).itemsize
    # blp (f32, single-buffered) + br (bf16, single-buffered) + gather scratch
    # + double-buffered output tile.
    vmem_bytes = (v * m * 4 + m * e_pad * 2 + tile_n * m * 4
                  + 2 * tile_n * e_pad * out_itemsize)

    grid_spec = pltpu.PrefetchScalarGridSpec(
        num_scalar_prefetch=1,                       # ids -> SMEM
        grid=(num_tiles,),
        in_specs=[
            # Constant block index -> fetched once, VMEM-resident; Buffered(1)
            # disables the (useless) double-buffering of the factors.
            pl.BlockSpec((v, m), lambda i, ids: (0, 0),
                         pipeline_mode=pl.Buffered(buffer_count=1)),
            pl.BlockSpec((m, e_pad), lambda i, ids: (0, 0),
                         pipeline_mode=pl.Buffered(buffer_count=1)),
        ],
        out_specs=pl.BlockSpec((tile_n, e_pad), lambda i, ids: (i, 0)),
        scratch_shapes=[pltpu.VMEM((tile_n, m), jnp.float32)],
    )

    out = pl.pallas_call(
        _factor_matmul_kernel,
        out_shape=jax.ShapeDtypeStruct((n_pad, e_pad), out_dtype),
        grid_spec=grid_spec,
        compiler_params=pltpu.CompilerParams(
            dimension_semantics=("parallel",),       # token tiles independent
            vmem_limit_bytes=int(min(vmem_bytes + (16 << 20), 128 << 20))),
        cost_estimate=pl.CostEstimate(
            flops=2 * n_pad * m * e_pad, transcendentals=0,
            bytes_accessed=(v * m * 4 + m * e_pad * 2
                            + n_pad * e_pad * out_itemsize + n_pad * 4)),
    )(ids_p, blp_f32, br_bf16_p)

    return out[:n, :e]


def monarch_table_gather(ids_flat, table_p, e, *, tile_n=256,
                         out_dtype=jnp.float32):
    """ids_flat: (N,) int32; table_p: (V, E_pad). Pure row gather (no matmul)."""
    n = int(ids_flat.shape[0])
    v, e_pad = table_p.shape
    assert e_pad % 128 == 0 and e <= e_pad

    tile_n = _round_tile(tile_n, n)
    n_pad = ((n + tile_n - 1) // tile_n) * tile_n
    num_tiles = n_pad // tile_n
    ids_p = jnp.pad(ids_flat.astype(jnp.int32), (0, n_pad - n))

    tab_itemsize = jnp.dtype(table_p.dtype).itemsize
    out_itemsize = jnp.dtype(out_dtype).itemsize
    vmem_bytes = v * e_pad * tab_itemsize + 2 * tile_n * e_pad * out_itemsize

    grid_spec = pltpu.PrefetchScalarGridSpec(
        num_scalar_prefetch=1,
        grid=(num_tiles,),
        in_specs=[
            pl.BlockSpec((v, e_pad), lambda i, ids: (0, 0),
                         pipeline_mode=pl.Buffered(buffer_count=1)),
        ],
        out_specs=pl.BlockSpec((tile_n, e_pad), lambda i, ids: (i, 0)),
    )

    out = pl.pallas_call(
        _table_gather_kernel,
        out_shape=jax.ShapeDtypeStruct((n_pad, e_pad), out_dtype),
        grid_spec=grid_spec,
        compiler_params=pltpu.CompilerParams(
            dimension_semantics=("parallel",),
            vmem_limit_bytes=int(min(vmem_bytes + (16 << 20), 128 << 20))),
        cost_estimate=pl.CostEstimate(
            flops=0, transcendentals=0,
            bytes_accessed=(v * e_pad * tab_itemsize
                            + n_pad * e_pad * out_itemsize + n_pad * 4)),
    )(ids_p, table_p)

    return out[:n, :e]


# ---------------- module wrapper ----------------

class MonarchOPTLearnedPositionalEmbedding:
    def __init__(self, kl, bl1, bl2, kr, br1, br2, key,
                 use_pl=False, use_pr=False):
        assert kl * bl2 == kr * br1, "middle dims of Monarch factors must match"
        # TODO(synk): use_pl/use_pr permutations need gs_project_matrix /
        # inverse_permutation (not provided); only the default config is supported.
        assert not use_pl and not use_pr
        self.offset = 2
        self.kl, self.bl1, self.bl2 = kl, bl1, bl2
        self.kr, self.br1, self.br2 = kr, br1, br2
        self.vocab = kl * bl1
        self.emb = kr * br2

        k_l, k_r = jax.random.split(key)
        # nn.init.normal_(·, std=0.001), deterministic via PRNGKey
        self.L = 0.001 * jax.random.normal(k_l, (kl, bl1, bl2), jnp.float32)
        self.R = 0.001 * jax.random.normal(k_r, (kr, br1, br2), jnp.float32)
        self.p = jnp.asarray(generate_perfect_shuffle(kl, bl2 * kl), jnp.int32)

        # ---- cached, padded factors (built once, not per forward call) ----
        e_pad = ((self.emb + 127) // 128) * 128          # lane-dense output
        blp = block_diag_3d(self.L)[:, self.p]           # (V, M) f32
        br = block_diag_3d(self.R)                       # (M, E) f32
        # bf16 MXU path: br stored bf16; blp kept f32 so the row gather avoids
        # the bf16 sublane-pack penalty (gathered tile is cast to bf16 in-kernel).
        self._blp_f32 = blp
        self._br_bf16_p = jnp.pad(
            br, ((0, 0), (0, e_pad - self.emb))).astype(jnp.bfloat16)
        self._e_pad = e_pad
        self._table_f32_p = None    # lazy dense (V, E_pad) table for gather path

    def _table(self):
        if self._table_f32_p is None:
            self._table_f32_p = jnp.dot(
                self._blp_f32.astype(jnp.bfloat16), self._br_bf16_p,
                preferred_element_type=jnp.float32)
        return self._table_f32_p

    def weight(self):
        """Dense (V, E) embedding table (bf16-factor compute, f32 accumulate)."""
        return self._table()[:, :self.emb]

    def __call__(self, attention_mask, past_key_values_length=0,
                 position_ids=None, tile_n=256, out_dtype=jnp.float32,
                 force_path=None):
        if position_ids is None:
            position_ids = jnp.cumsum(attention_mask, axis=1)
            position_ids = (position_ids * attention_mask - 1).astype(jnp.int32)
            position_ids = position_ids[:, past_key_values_length:]
        ids = (position_ids + self.offset).astype(jnp.int32)
        # Guard against silent OOB VMEM reads (TPU has no runtime bounds check).
        ids = jnp.clip(ids, 0, self.vocab - 1)
        B, S = ids.shape
        n = B * S

        use_table = (force_path == "table"
                     or (force_path is None and n >= self.vocab))
        if use_table:
            # N >= V: form the (V, E) table once (small matmul) and do a pure,
            # memory-bound row gather per token tile.
            out = monarch_table_gather(ids.reshape(n), self._table(), self.emb,
                                       tile_n=tile_n, out_dtype=out_dtype)
        else:
            out = monarch_factor_matmul(ids.reshape(n), self._blp_f32,
                                        self._br_bf16_p, self.emb,
                                        tile_n=tile_n, out_dtype=out_dtype)
        return out.reshape(B, S, self.emb)


# ---------------- reference (plain JAX) for verification ----------------

def reference_forward(mod, attention_mask, past_key_values_length=0):
    position_ids = jnp.cumsum(attention_mask, axis=1)
    position_ids = (position_ids * attention_mask - 1).astype(jnp.int32)
    position_ids = position_ids[:, past_key_values_length:]
    ids = position_ids + mod.offset
    return mod.weight()[ids]


if __name__ == "__main__":
    key = jax.random.PRNGKey(0)

    # small consistent shapes: vocab = kl*bl1 = 32 (>= max position id + 2),
    # middle = kl*bl2 = kr*br1 = 16, emb = kr*br2 = 32.
    kl, bl1, bl2 = 4, 8, 4
    kr, br1, br2 = 4, 4, 8
    module = MonarchOPTLearnedPositionalEmbedding(kl, bl1, bl2, kr, br1, br2, key)

    B, S = 2, 24
    mask = jnp.ones((B, S), jnp.int32)
    mask = mask.at[1, 13:].set(0)   # ragged second row -> non-consecutive ids

    ref = reference_forward(module, mask)

    # factor-matmul path (tile_n=16 -> 3 token tiles, exercises both the
    # consecutive-id fast copy and the vreg-assembled slow gather).
    out_mm = module(mask, tile_n=16, force_path="matmul")
    out_mm = jax.block_until_ready(out_mm)
    assert out_mm.shape == (B, S, kr * br2), out_mm.shape
    assert out_mm.dtype == jnp.float32
    assert jnp.allclose(out_mm, ref, atol=1e-7, rtol=1e-4), "matmul path mismatch"

    # dense-table gather path (default dispatch here since B*S >= vocab).
    out_tab = module(mask)
    out_tab = jax.block_until_ready(out_tab)
    assert out_tab.shape == (B, S, kr * br2), out_tab.shape
    assert jnp.allclose(out_tab, ref, atol=1e-7, rtol=1e-4), "table path mismatch"

    print("KERNEL_OK")
</pallas_src>

<mosaic_0001>
module attributes {stable_mosaic.version = 11 : i64} {
  func.func @_factor_matmul_kernel(%arg0: i32, %arg1: memref<48xi32, #tpu.memory_space<smem>>, %arg2: memref<32x16xf32, #tpu.memory_space<vmem>>, %arg3: memref<16x128xbf16, #tpu.memory_space<vmem>>, %arg4: memref<16x128xf32, #tpu.memory_space<vmem>>, %arg5: memref<16x16xf32, #tpu.memory_space<vmem>>) attributes {dimension_semantics = [#tpu.dimension_semantics<parallel>], iteration_bounds = array<i64: 3>, scalar_prefetch = 1 : i64, scratch_operands = 1 : i64, tpu.core_type = #tpu.core_type<tc>, window_params = [{pipeline_mode = #tpu.pipeline_mode<synchronous>, transform_indices = @transform_0, window_bounds = array<i64: 32, 16>}, {pipeline_mode = #tpu.pipeline_mode<synchronous>, transform_indices = @transform_1, window_bounds = array<i64: 16, 128>}, {transform_indices = @transform_2, window_bounds = array<i64: 16, 128>}]} {
    %c16_i32 = arith.constant 16 : i32
    %0 = arith.muli %arg0, %c16_i32 : i32
    %c0_i32 = arith.constant 0 : i32
    %c2_i32 = arith.constant 2 : i32
    %1 = arith.addi %c0_i32, %c2_i32 : i32
    %c1_i32 = arith.constant 1 : i32
    scf.for %arg6 = %c0_i32 to %1 step %c1_i32  : i32 {
      %c1_i32_6 = arith.constant 1 : i32
      %7 = arith.muli %arg6, %c1_i32_6 : i32
      %c0_i32_7 = arith.constant 0 : i32
      %8 = arith.addi %c0_i32_7, %7 : i32
      %c8_i32 = arith.constant 8 : i32
      %9 = arith.muli %8, %c8_i32 : i32
      %10 = tpu.assume_multiple %9, 8 : i32
      %11 = arith.addi %0, %10 : i32
      %c0_i32_8 = arith.constant 0 : i32
      %12 = arith.addi %11, %c0_i32_8 : i32
      %13 = arith.index_cast %12 : i32 to index
      %14 = memref.load %arg1[%13] : memref<48xi32, #tpu.memory_space<smem>>
      %15 = arith.addi %0, %10 : i32
      %c1_i32_9 = arith.constant 1 : i32
      %16 = arith.addi %15, %c1_i32_9 : i32
      %17 = arith.index_cast %16 : i32 to index
      %18 = memref.load %arg1[%17] : memref<48xi32, #tpu.memory_space<smem>>
      %19 = arith.addi %0, %10 : i32
      %c2_i32_10 = arith.constant 2 : i32
      %20 = arith.addi %19, %c2_i32_10 : i32
      %21 = arith.index_cast %20 : i32 to index
      %22 = memref.load %arg1[%21] : memref<48xi32, #tpu.memory_space<smem>>
      %23 = arith.addi %0, %10 : i32
      %c3_i32 = arith.constant 3 : i32
      %24 = arith.addi %23, %c3_i32 : i32
      %25 = arith.index_cast %24 : i32 to index
      %26 = memref.load %arg1[%25] : memref<48xi32, #tpu.memory_space<smem>>
      %27 = arith.addi %0, %10 : i32
      %c4_i32 = arith.constant 4 : i32
      %28 = arith.addi %27, %c4_i32 : i32
      %29 = arith.index_cast %28 : i32 to index
      %30 = memref.load %arg1[%29] : memref<48xi32, #tpu.memory_space<smem>>
      %31 = arith.addi %0, %10 : i32
      %c5_i32 = arith.constant 5 : i32
      %32 = arith.addi %31, %c5_i32 : i32
      %33 = arith.index_cast %32 : i32 to index
      %34 = memref.load %arg1[%33] : memref<48xi32, #tpu.memory_space<smem>>
      %35 = arith.addi %0, %10 : i32
      %c6_i32 = arith.constant 6 : i32
      %36 = arith.addi %35, %c6_i32 : i32
      %37 = arith.index_cast %36 : i32 to index
      %38 = memref.load %arg1[%37] : memref<48xi32, #tpu.memory_space<smem>>
      %39 = arith.addi %0, %10 : i32
      %c7_i32 = arith.constant 7 : i32
      %40 = arith.addi %39, %c7_i32 : i32
      %41 = arith.index_cast %40 : i32 to index
      %42 = memref.load %arg1[%41] : memref<48xi32, #tpu.memory_space<smem>>
      %c1_i32_11 = arith.constant 1 : i32
      %43 = arith.addi %14, %c1_i32_11 : i32
      %44 = arith.cmpi eq, %18, %43 : i32
      %c2_i32_12 = arith.constant 2 : i32
      %45 = arith.addi %14, %c2_i32_12 : i32
      %46 = arith.cmpi eq, %22, %45 : i32
      %47 = arith.andi %44, %46 : i1
      %c3_i32_13 = arith.constant 3 : i32
      %48 = arith.addi %14, %c3_i32_13 : i32
      %49 = arith.cmpi eq, %26, %48 : i32
      %50 = arith.andi %47, %49 : i1
      %c4_i32_14 = arith.constant 4 : i32
      %51 = arith.addi %14, %c4_i32_14 : i32
      %52 = arith.cmpi eq, %30, %51 : i32
      %53 = arith.andi %50, %52 : i1
      %c5_i32_15 = arith.constant 5 : i32
      %54 = arith.addi %14, %c5_i32_15 : i32
      %55 = arith.cmpi eq, %34, %54 : i32
      %56 = arith.andi %53, %55 : i1
      %c6_i32_16 = arith.constant 6 : i32
      %57 = arith.addi %14, %c6_i32_16 : i32
      %58 = arith.cmpi eq, %38, %57 : i32
      %59 = arith.andi %56, %58 : i1
      %c7_i32_17 = arith.constant 7 : i32
      %60 = arith.addi %14, %c7_i32_17 : i32
      %61 = arith.cmpi eq, %42, %60 : i32
      %62 = arith.andi %59, %61 : i1
      %63 = arith.extui %62 : i1 to i32
      %c0_i32_18 = arith.constant 0 : i32
      %64 = arith.cmpi ne, %63, %c0_i32_18 : i32
      scf.if %64 {
        %68 = arith.index_cast %14 : i32 to index
        %c0_20 = arith.constant 0 : index
        %69 = vector.load %arg2[%68, %c0_20] : memref<32x16xf32, #tpu.memory_space<vmem>>, vector<8x16xf32>
        %70 = arith.index_cast %10 : i32 to index
        %c0_21 = arith.constant 0 : index
        %71 = vector.load %arg5[%70, %c0_21] : memref<16x16xf32, #tpu.memory_space<vmem>>, vector<8x16xf32>
        tpu.vector_store %arg5[%70, %c0_21], %69 {strides = array<i32>} : memref<16x16xf32, #tpu.memory_space<vmem>>, vector<8x16xf32>,
      } else {
      }
      %true = arith.constant true
      %65 = arith.xori %62, %true : i1
      %66 = arith.extui %65 : i1 to i32
      %c0_i32_19 = arith.constant 0 : i32
      %67 = arith.cmpi ne, %66, %c0_i32_19 : i32
      scf.if %67 {
        %68 = arith.index_cast %14 : i32 to index
        %c0_20 = arith.constant 0 : index
        %69 = vector.load %arg2[%68, %c0_20] : memref<32x16xf32, #tpu.memory_space<vmem>>, vector<1x16xf32>
        %70 = arith.index_cast %18 : i32 to index
        %c0_21 = arith.constant 0 : index
        %71 = vector.load %arg2[%70, %c0_21] : memref<32x16xf32, #tpu.memory_space<vmem>>, vector<1x16xf32>
        %72 = arith.index_cast %22 : i32 to index
        %c0_22 = arith.constant 0 : index
        %73 = vector.load %arg2[%72, %c0_22] : memref<32x16xf32, #tpu.memory_space<vmem>>, vector<1x16xf32>
        %74 = arith.index_cast %26 : i32 to index
        %c0_23 = arith.constant 0 : index
        %75 = vector.load %arg2[%74, %c0_23] : memref<32x16xf32, #tpu.memory_space<vmem>>, vector<1x16xf32>
        %76 = arith.index_cast %30 : i32 to index
        %c0_24 = arith.constant 0 : index
        %77 = vector.load %arg2[%76, %c0_24] : memref<32x16xf32, #tpu.memory_space<vmem>>, vector<1x16xf32>
        %78 = arith.index_cast %34 : i32 to index
        %c0_25 = arith.constant 0 : index
        %79 = vector.load %arg2[%78, %c0_25] : memref<32x16xf32, #tpu.memory_space<vmem>>, vector<1x16xf32>
        %80 = arith.index_cast %38 : i32 to index
        %c0_26 = arith.constant 0 : index
        %81 = vector.load %arg2[%80, %c0_26] : memref<32x16xf32, #tpu.memory_space<vmem>>, vector<1x16xf32>
        %82 = arith.index_cast %42 : i32 to index
        %c0_27 = arith.constant 0 : index
        %83 = vector.load %arg2[%82, %c0_27] : memref<32x16xf32, #tpu.memory_space<vmem>>, vector<1x16xf32>
        %84 = tpu.concatenate %69, %71, %73, %75, %77, %79, %81, %83 in 0 : vector<1x16xf32>, vector<1x16xf32>, vector<1x16xf32>, vector<1x16xf32>, vector<1x16xf32>, vector<1x16xf32>, vector<1x16xf32>, vector<1x16xf32> -> vector<8x16xf32>
        %85 = arith.index_cast %10 : i32 to index
        %c0_28 = arith.constant 0 : index
        %86 = vector.load %arg5[%85, %c0_28] : memref<16x16xf32, #tpu.memory_space<vmem>>, vector<8x16xf32>
        tpu.vector_store %arg5[%85, %c0_28], %84 {strides = array<i32>} : memref<16x16xf32, #tpu.memory_space<vmem>>, vector<8x16xf32>,
      } else {
      }
    }
    %c2_i32_0 = arith.constant 2 : i32
    %c0 = arith.constant 0 : index
    %c0_1 = arith.constant 0 : index
    %2 = vector.load %arg5[%c0, %c0_1] : memref<16x16xf32, #tpu.memory_space<vmem>>, vector<16x16xf32>
    %3 = arith.truncf %2 : vector<16x16xf32> to vector<16x16xbf16>
    %c0_2 = arith.constant 0 : index
    %c0_3 = arith.constant 0 : index
    %4 = vector.load %arg3[%c0_2, %c0_3] : memref<16x128xbf16, #tpu.memory_space<vmem>>, vector<16x128xbf16>
    %cst = arith.constant dense<0.000000e+00> : vector<16x128xf32>
    %5 = tpu.matmul %3, %4, %cst {dimension_numbers = #tpu.dot_dimension_numbers<[1], [0], [0], [1], [0, 0, 1, 1], [], []>} : vector<16x16xbf16>, vector<16x128xbf16>, vector<16x128xf32> -> vector<16x128xf32>
    %c0_4 = arith.constant 0 : index
    %c0_5 = arith.constant 0 : index
    %6 = vector.load %arg4[%c0_4, %c0_5] : memref<16x128xf32, #tpu.memory_space<vmem>>, vector<16x128xf32>
    tpu.vector_store %arg4[%c0_4, %c0_5], %5 {strides = array<i32>} : memref<16x128xf32, #tpu.memory_space<vmem>>, vector<16x128xf32>,
    return
  }
  func.func @transform_0(%arg0: i32, %arg1: memref<48xi32, #tpu.memory_space<smem>>) -> (i32, i32) {
    %c0_i32 = arith.constant 0 : i32
    %c0_i32_0 = arith.constant 0 : i32
    %c0_i32_1 = arith.constant 0 : i32
    return %c0_i32, %c0_i32_0 : i32, i32
  }
  func.func @transform_1(%arg0: i32, %arg1: memref<48xi32, #tpu.memory_space<smem>>) -> (i32, i32) {
    %c0_i32 = arith.constant 0 : i32
    %c0_i32_0 = arith.constant 0 : i32
    %c0_i32_1 = arith.constant 0 : i32
    return %c0_i32, %c0_i32_0 : i32, i32
  }
  func.func @transform_2(%arg0: i32, %arg1: memref<48xi32, #tpu.memory_space<smem>>) -> (i32, i32) {
    %c0_i32 = arith.constant 0 : i32
    %c0_i32_0 = arith.constant 0 : i32
    return %arg0, %c0_i32 : i32, i32
  }
}

</mosaic_0001>

<bundles_post_ra>
// kernel: tpu_custom_call.1
= control target key start
LH: loop header
LB: loop body
LE: loop exit
PB: predicated region body
PF: predicated region fallthrough
CT: control target
= control target key end

     0   :  { %s769_s0 = inlined_call_operand.vmem [shape: s32[48], index: 0, kind: input, shape index: {}]   ;;  %s770_s1 = inlined_call_operand.vmem [shape: f32[32,16], index: 1, kind: input, shape index: {}]   ;;  %s771_s2 = inlined_call_operand.vmem [shape: bf16[16,128], index: 2, kind: input, shape index: {}]   ;;  %s772_s3 = inlined_call_operand.hbm [shape: f32[48,128], index: 3, kind: output, shape index: {}]  }
   0x1   :  { %s8_s14 = sshll.u32 %s769_s0, 4  ;;  %s9_s14 = int_to_ptr.vmem [resolvable:$true] %s8_s14 }
   0x2   :  { %s460_s15 = scalar_lea.vmem %s9_s14, 16  ;;  %p465_p1 = scmp.lt.s32.totalorder %s9_s14, %s9_s14 }
   0x3   :  { %p461_p0 = scmp.ne.s32.totalorder %s9_s14, %s460_s15  ;;  %p466_p2 = scmp.lt.s32.totalorder %s460_s15, %s460_s15 }
   0x5   :  { %p467_p3 = por %p466_p2, %p465_p1 }
   0x7   :  { %p468_p4 = pnand %p467_p3, %p461_p0 }
   0x9   :  { %471 = shalt.err (!%p468_p4)  }
   0xa   :  { %s544_s16 = smov [#allocation4]  }
   0xb   :  { %11 = dma.vmem_to_smem %s9_s14, 16, %s544_s16, [#allocation3] }
   0xc   :  { %518 = dma.done.wait [#allocation3], 16 }
   0xd   :  { %519 = vsyncadd [#allocation3], 4294967280 }
   0xe   :  { %13 = sfence }
   0xf   :  { %14 = vsyncpa [#allocation6], 0 }
  0x10   :  { %16 = vsyncpa [#allocation6 + $0x1], 0  ;;  %s573_s17 = smov 0   ;;  %s575_s18 = smov 0  }
  0x11   :  { %s577_s0 = smov 0   ;;  %s579_s19 = smov 0  }
  0x12 LB: > { %778 = sst [smem:[#allocation9_spill]] %s534_s0  ;;  %s594_s20 = sadd.s32 4294967295, %s538_s19   ;;  %s538_s19 = sphi %s579_s19, %s787_s19   ;;  %s534_s0 = sphi %s577_s0, %s789_s0   ;;  %s530_s18 = sphi %s575_s18, %s791_s18   ;;  %s526_s17 = sphi %s573_s17, %s790_s17  }
  0x13   : > { %s385_s21 = sadd.s32 4294967294, %s538_s19   ;;  %s598_s22 = sadd.s32 1, %s538_s19  }
  0x14   : > { %779 = sst [smem:[#allocation10_spill]] %s598_s22  ;;  %s71_s23 = sadd.s32 1, %s534_s0 }
  0x15   : > { %s68_s24 = ssub.s32 %s538_s19, %s598_s22  ;;  %p81_p5 = scmp.ne.s32.totalorder %s534_s0, %s530_s18 }
  0x16   : > { %p69_p6 = scmp.eq.s32.totalorder %s68_s24, 0  ;;  %p82_p7 = scmp.eq.s32.totalorder %s594_s20, 2 }
  0x17   : > { %p87_p8 = scmp.ne.s32.totalorder %s530_s18, %s526_s17  ;;  %p88_p9 = scmp.eq.s32.totalorder %s385_s21, 2 }
  0x18   : > { %s609_s25 = scalar_select %p69_p6, %s534_s0, %s71_s23  }
  0x19   : > { %p611_p10 = por %p82_p7, %p81_p5  ;;  %p615_p11 = por %p88_p9, %p87_p8 }
  0x1a   : > { %780 = sst [smem:[#allocation11_spill]] %s609_s25  ;;  %p387_p12 = scmp.ge.s32.totalorder %s538_s19, 1 }
  0x1b   : > { %s781_s26 = scalar_select %p611_p10, 1, 0 }
  0x1c   : > { %s782_s27 = scalar_select %p615_p11, 1, 0 }
  0x1d   : > { %p112_p13 = scmp.lt.s32.totalorder %s538_s19, 4 }
  0x1f   : > { %p113_p0 = pnand %p387_p12, %p112_p13 }
  0x20   : > { %s774_s28 = sand.u32 (!%p113_p0), 1, %s530_s18   ;;  %s627_s5 = smov (!%p113_p0), 0  }
  0x21   : > { %116 = sbr.rel (%p113_p0) target bundleno = 313 (0x139), region = 28  ;;  %s388_s30 = sshll.u32 (!%p113_p0), %s774_s28, 4 }
  0x22   : > { %s625_s4 = scalar_lea.vmem (!%p113_p0), [#allocation5], %s388_s30 }
  0x26 LB: >> { %s633_s6 = sshll.u32 %s542_s5, 3  ;;  %s783_s29 = sshll.u32 %s594_s20, 4  ;;  %s542_s5 = sphi %s627_s5, %s137_s5  }
  0x27   : >> { %s139_s7 = sadd.s32 %s633_s6, %s783_s29 }
  0x28   : >> { %s638_s8 = sld [smem:[#allocation4 + %s139_s7]]  ;;  %s141_s9 = sadd.s32 1, %s139_s7 }
  0x29   : >> { %s640_s10 = sld [smem:[#allocation4 + %s141_s9]]  ;;  %s143_s11 = sadd.s32 2, %s139_s7 }
  0x2a   : >> { %s642_s12 = sld [smem:[#allocation4 + %s143_s11]]  ;;  %s145_s13 = sadd.s32 3, %s139_s7 }
  0x2b   : >> { %s644_s14 = sld [smem:[#allocation4 + %s145_s13]]  ;;  %s147_s15 = sadd.s32 4, %s139_s7 }
  0x2c   : >> { %s646_s16 = sld [smem:[#allocation4 + %s147_s15]]  ;;  %s149_s21 = sadd.s32 5, %s139_s7 }
  0x2d   : >> { %s653_s9 = sld [smem:[#allocation4 + %s149_s21]]  ;;  %s151_s11 = sadd.s32 6, %s139_s7 }
  0x2e   : >> { %s155_s23 = sadd.s32 1, %s638_s8  ;;  %s157_s24 = sadd.s32 2, %s638_s8 }
  0x2f   : >> { %p156_p1 = scmp.eq.s32.totalorder %s640_s10, %s155_s23  ;;  %s161_s30 = sadd.s32 3, %s638_s8 }
  0x30   : >> { %p158_p2 = scmp.eq.s32.totalorder %s642_s12, %s157_s24  ;;  %s165_s13 = sadd.s32 4, %s638_s8 }
  0x31   : >> { %p162_p4 = scmp.eq.s32.totalorder %s644_s14, %s161_s30  ;;  %s657_s15 = sld [smem:[#allocation4 + %s151_s11]] }
  0x32   : >> { %p159_p3 = pnand %p158_p2, %p156_p1  ;;  %s153_s29 = sadd.s32 7, %s139_s7 }
  0x33   : >> { %p166_p7 = scmp.eq.s32.totalorder %s646_s16, %s165_s13  ;;  %s169_s23 = sadd.s32 5, %s638_s8 }
  0x34   : >> { %p160_p5 = pneg %p159_p3  ;;  %s661_s24 = sld [smem:[#allocation4 + %s153_s29]] }
  0x35   : >> { %p170_p12 = scmp.eq.s32.totalorder %s653_s9, %s169_s23  ;;  %s173_s21 = sadd.s32 6, %s638_s8 }
  0x36   : >> { %p163_p6 = pnand %p162_p4, %p160_p5  ;;  %s177_s30 = sadd.s32 7, %s638_s8 }
  0x37   : >> { %p174_p1 = scmp.eq.s32.totalorder %s657_s15, %s173_s21 }
  0x38   : >> { %p164_p8 = pneg %p163_p6 }
  0x3a   : >> { %p167_p9 = pnand %p166_p7, %p164_p8  ;;  %p178_p11 = scmp.eq.s32.totalorder %s661_s24, %s177_s30 }
  0x3c   : >> { %p168_p13 = pneg %p167_p9 }
  0x3e   : >> { %p171_p0 = pnand %p170_p12, %p168_p13 }
  0x40   : >> { %p172_p2 = pneg %p171_p0 }
  0x42   : >> { %p175_p3 = pnand %p174_p1, %p172_p2 }
  0x44   : >> { %p176_p10 = pneg %p175_p3 }
  0x46   : >> { %p179_p4 = pnand %p178_p11, %p176_p10 }
  0x47   : >> { %s183_s29 = scalar_lea.vmem (!%p179_p4), %s770_s1, %s638_s8  ;;  %s185_s13 = scalar_lea.vmem (!%p179_p4), [#allocation2], %s633_s6 }
  0x48   : >> { %182 = sbr.rel (%p179_p4) target bundleno = 79 (0x4f), region = 39 }
  0x4d   : >> { %vm186_vm0 = vcmask 130048   ;;  %v184_v0 = vld [vmem:[%s183_s29] sm:$0xff] }
  0x4e   : >> { %187 = vst.msk [vmem:[%s185_s13] sm:$0xff] %vm186_vm0, %v184_v0 }
  0x4f PF: >> { %190 = sbr.rel (!%p179_p4) target bundleno = 92 (0x5c), region = 43  ;;  %s191_s30 = scalar_lea.vmem (%p179_p4), %s770_s1, %s638_s8  ;;  %vm228_vm1 = vcmask (%p179_p4), 1040384   ;;  %vm230_vm2 = vcmask (%p179_p4), 1041408   ;;  %vm232_vm3 = vcmask (%p179_p4), 1042432   ;;  %vm234_vm4 = vcmask (%p179_p4), 1043456  }
  0x50   : >> { %s193_s11 = scalar_lea.vmem (%p179_p4), %s770_s1, %s640_s10  ;;  %v192_v1 = vld [vmem:[%s191_s30] sm:$0x1] (%p179_p4)  ;;  %s195_s25 = scalar_lea.vmem (%p179_p4), %s770_s1, %s642_s12  ;;  %vm236_vm5 = vcmask (%p179_p4), 1044480   ;;  %vm238_vm6 = vcmask (%p179_p4), 1045504   ;;  %vm240_vm7 = vcmask (%p179_p4), 1046528   ;;  %vm243_vm8 = vcmask (%p179_p4), 130048  }
  0x51   : >> { %v194_v2 = vld [vmem:[%s193_s11] sm:$0x1] (%p179_p4)  ;;  %s197_s0 = scalar_lea.vmem (%p179_p4), %s770_s1, %s644_s14  ;;  %s199_s10 = scalar_lea.vmem (%p179_p4), %s770_s1, %s646_s16 }
  0x52   : >> { %v196_v3 = vld [vmem:[%s195_s25] sm:$0x1] (%p179_p4)  ;;  %s201_s30 = scalar_lea.vmem (%p179_p4), %s770_s1, %s653_s9  ;;  %v208_v5 = vrot.slane (%p179_p4), %v194_v2, 7  ;;  %s203_s14 = scalar_lea.vmem (%p179_p4), %s770_s1, %s657_s15 }
  0x53   : >> { %v198_v4 = vld [vmem:[%s197_s0] sm:$0x1] (%p179_p4)  ;;  %s205_s0 = scalar_lea.vmem (%p179_p4), %s770_s1, %s661_s24  ;;  %v211_v8 = vrot.slane (%p179_p4), %v196_v3, 6  ;;  %s242_s22 = scalar_lea.vmem (%p179_p4), [#allocation2], %s633_s6 }
  0x54   : >> { %v200_v6 = vld [vmem:[%s199_s10] sm:$0x1]  ;;  %v214_v9 = vrot.slane %v198_v4, 5  ;;  %v229_v14 = vsel %vm228_vm1, %v192_v1, %v208_v5 }
  0x55   : >> { %v202_v7 = vld [vmem:[%s201_s30] sm:$0x1]  ;;  %v217_v12 = vrot.slane %v200_v6, 4  ;;  %v231_v16 = vsel %vm230_vm2, %v229_v14, %v211_v8 }
  0x56   : >> { %v204_v10 = vld [vmem:[%s203_s14] sm:$0x1]  ;;  %v220_v13 = vrot.slane %v202_v7, 3  ;;  %v233_v18 = vsel %vm232_vm3, %v231_v16, %v214_v9 }
  0x57   : >> { %v206_v11 = vld [vmem:[%s205_s0] sm:$0x1]  ;;  %v223_v15 = vrot.slane %v204_v10, 2  ;;  %v235_v19 = vsel %vm234_vm4, %v233_v18, %v217_v12 }
  0x58   : >> { %v226_v17 = vrot.slane %v206_v11, 1  ;;  %v237_v20 = vsel %vm236_vm5, %v235_v19, %v220_v13 }
  0x59   : >> { %v239_v21 = vsel %vm238_vm6, %v237_v20, %v223_v15 }
  0x5a   : >> { %v241_v22 = vsel %vm240_vm7, %v239_v21, %v226_v17 }
  0x5b   : >> { %244 = vst.msk [vmem:[%s242_s22] sm:$0xff] %vm243_vm8, %v241_v22 }
  0x5c PF: >> { %s137_s5 = sadd.s32 1, %s542_s5  }
  0x5d   : >> { %p134_p10 = scmp.ge.s32.totalorder %s137_s5, 2  }
  0x5e   : > { %v459_v23 = vld [vmem:[%s771_s2] sm:$0xff] (%p134_p10)   ;;  %v545_v24 = vmov (%p134_p10), 0.0   ;;  %vm546_vm9 = vmmov (%p134_p10), 0   ;;  %vm256_vm10 = vcmask (%p134_p10), 130048   ;;  %s398_s5 = sshll.u32 (%p134_p10), %s594_s20, 8  ;;  %s317_s6 = sshll.u32 (%p134_p10), %s625_s4, 4  ;;  %s724_s6 = int_to_ptr.vmem [resolvable:$true] %s317_s6 }
  0x5f   : > { %136 = sbr.rel (!%p134_p10) target bundleno = 38 (0x26), region = 86  ;;  %401 = vmatprep.subr.bf16.mxu0 (%p134_p10), %v545_v24  ;;  %403 = vmatprep.mubr.msk.bf16.mxu0 (%p134_p10), %vm546_vm9, %v545_v24  ;;  %s722_s24 = scalar_lea.hbm (%p134_p10), %s772_s3, %s398_s5 }
  0x60   : > { %402 = vmatpush3.bf16.msra.mxu0 (%p134_p10), %v459_v23  ;;  %s784_s23 = sand.u32 (%p134_p10), 1, %s530_s18   ;;  %s472_s20 = scalar_lea.vmem (%p134_p10), %s724_s6, 256 }
  0x61   : > { %s729_s21 = scalar_lea.sflag (%p134_p10), [#allocation6], %s784_s23  ;;  %p473_p11 = scmp.ne.s32.totalorder (%p134_p10), %s724_s6, %s472_s20 }
  0x62   : > { %v245_v25 = vld [vmem:[#allocation2] sm:$0xff] (%p134_p10)  ;;  %v246_v26 = vld [vmem:[#allocation2 + $0x8] sm:$0xff] (%p134_p10)  ;;  %p785_p5 = scmp.ne.s32.totalorder (%p134_p10), %s781_s26, 0  ;;  %s547_s8 = smov (%p134_p10), [#allocation5]  }
  0x63   : > { %v247_v27 = vpack.c.bf16 (%p134_p10), %v246_v26, %v245_v25  ;;  %s476_s28 = sshll.u32 (%p134_p10), %s547_s8, 4  ;;  %s477_s28 = int_to_ptr.vmem [resolvable:$false] %s476_s28 }
  0x64   : > { %p474_p6 = pnand %p473_p11, %p785_p5  ;;  %s478_s10 = scalar_lea.vmem %s477_s28, 512 }
  0x65   : > { %404 = vmatmul.mubr.msk.bf16.vlgmr.msra.gmra.mxu0 %vm256_vm10, %v247_v27  ;;  %p479_p8 = scmp.lt.s32.totalorder %s724_s6, %s477_s28  ;;  %p480_p9 = scmp.lt.s32.totalorder %s478_s10, %s472_s20 }
  0x66   : > { %p475_p7 = pneg %p474_p6 }
  0x67   : > { %p481_p12 = por %p480_p9, %p479_p8 }
  0x69   : > { %p482_p13 = pnand %p481_p12, %p475_p7 }
 0x125   : > { %v294_v28 = vpop.f32.mrf.mxu0 }
 0x126   : > { %301 = vst [vmem:[%s625_s4] sm:$0xff] %v294_v28 }
 0x127   : > { %v405_v29 = vpop.f32.mrf.mxu0 }
 0x129   : > { %v297_v30 = vpop.f32.mrf.mxu0 }
 0x12a   : > { %302 = vst [vmem:[%s625_s4 + $0x8] sm:$0xff] %v297_v30 }
 0x12b   : > { %v406_v31 = vpop.f32.mrf.mxu0 }
 0x12c   : > { %485 = shalt.err (!%p482_p13)
}
 0x12d   : > { %s486_s4 = scalar_lea.hbm %s722_s24, 256  ;;  %s490_s12 = scalar_lea.hbm %s772_s3, 768 }
 0x12e   : > { %p487_p0 = scmp.ne.s32.totalorder %s722_s24, %s486_s4  ;;  %p491_p3 = scmp.lt.s32.totalorder %s722_s24, %s772_s3 }
 0x12f   : > { %p492_p4 = scmp.lt.s32.totalorder %s490_s12, %s486_s4 }
 0x130   : > { %p488_p1 = pnand %p487_p0, %p785_p5 }
 0x131   : > { %p493_p10 = por %p492_p4, %p491_p3 }
 0x132   : > { %p489_p2 = pneg %p488_p1 }
 0x134   : > { %p494_p11 = pnand %p493_p10, %p489_p2 }
 0x136   : > { %497 = shalt.err (!%p494_p11)
}
 0x137   : > { %s548_s29 = smov 128   ;;  %s549_s13 = smov 8  }
 0x138   : > { %407 = dma.vmem_to_hbm [thread:$0]  (%p785_p5), %s724_s6, 256, %s722_s24, %s729_s21, %s548_s29, %s548_s29, %s549_s13  }
 0x139 PF: > { %p413_p6 = scmp.ge.s32.totalorder %s538_s19, 2  ;;  %s332_s0 = sand.u32 1, %s526_s17  }
 0x13a   : > { %p786_p7 = scmp.ne.s32.totalorder %s782_s27, 0  ;;  %s333_s22 = scalar_lea.sflag [#allocation6], %s332_s0 }
 0x13c   : > { %p410_p8 = pnand %p413_p6, %p786_p7 }
 0x13e   : > { %p411_p9 = pneg %p410_p8 }
 0x140   : > { %521 = dma.done.wait (%p411_p9), %s333_s22, 256  }
 0x141   : > { %523 = vsyncadd (%p411_p9), %s333_s22, 4294967040  ;;  %s787_s19 = sld [smem:[#allocation10_spill]]  ;;  %s790_s17 = smov %s530_s18 }
 0x142   : > { %s788_s25 = sld [smem:[#allocation9_spill]] }
 0x143   : > { %s789_s0 = sld [smem:[#allocation11_spill]] }
 0x147   : > { %p19_p12 = scmp.ge.s32.totalorder %s787_s19, 5  }
 0x148   : > { %s791_s18 = smov %s788_s25 }
 0x149   :  { %21 = sbr.rel (!%p19_p12) target bundleno = 18 (0x12), region = 97 }
 0x14e   :  { %338 = vsyncpa [#allocation6], 1 }
 0x14f   :  { %340 = vsyncpa [#allocation6 + $0x1], 1 }

</bundles_post_ra>
